<compile_context>
chip_gen: v7x
topology: tpu7x:2x2x1
jax: 0.10.0
libtpu: 0.0.40
codegen_flags: <defaults>
</compile_context>

<pallas_src>
import functools

import jax
import jax.numpy as jnp
from jax.experimental import pallas as pl
from jax.experimental.pallas import tpu as pltpu

_LANE = 128
_SUBLANE = 8


def _round_up(x, m):
    return (x + m - 1) // m * m


def _critic_mlp_kernel(x_ref, w1_ref, b1_ref, w2_ref, b2_ref, w3r_ref, b3_ref, q_ref):
    """One (TILE_B, D) obs-flat tile -> 3-layer MLP -> (TILE_B, 1) Q column."""
    # In-kernel cast to the MXU compute dtype (VPU slot has huge slack here).
    x = x_ref[...].astype(w1_ref.dtype)
    # Layer 1 (duplicated-obs concat already folded into w1_ref by the wrapper).
    h1 = jnp.dot(x, w1_ref[...], preferred_element_type=jnp.float32) + b1_ref[...]
    h1 = jnp.maximum(h1, 0.0)                                   # hidden ReLU
    # Layer 2
    h2 = jnp.dot(h1.astype(w2_ref.dtype), w2_ref[...],
                 preferred_element_type=jnp.float32) + b2_ref[...]
    h2 = jnp.maximum(h2, 0.0)                                   # hidden ReLU
    # Output layer: single Q column via f32 multiply + lane reduce
    # (no padded MXU matmul, no 128-wide dead accumulator columns).
    q = jnp.sum(h2 * w3r_ref[...], axis=-1, keepdims=True) + b3_ref[...]
    q_ref[...] = q.astype(q_ref.dtype)


def init_critic_params(key, num_actor, input_size, output_size, hidden=(64, 64)):
    """Deterministic PyTorch-Linear-style init: U(-1/sqrt(fan_in), 1/sqrt(fan_in))."""
    dims = [input_size * num_actor] + list(hidden) + [output_size]
    params = []
    for i in range(len(dims) - 1):
        fan_in, fan_out = dims[i], dims[i + 1]
        key, kw, kb = jax.random.split(key, 3)
        bound = 1.0 / float(fan_in) ** 0.5
        w = jax.random.uniform(kw, (fan_in, fan_out), jnp.float32, -bound, bound)
        b = jax.random.uniform(kb, (1, fan_out), jnp.float32, -bound, bound)
        params += [w, b]
    return params


@functools.partial(jax.jit,
                   static_argnames=("num_actor", "tile_b", "compute_dtype"))
def critic_forward(obs, action, params, *, num_actor,
                   tile_b=4096, compute_dtype=jnp.bfloat16):
    a1, na1, c1 = obs.shape
    a2, na2, _ = action.shape
    assert na1 == num_actor and na2 == num_actor and a1 == a2
    assert tile_b % _SUBLANE == 0

    w1, b1, w2, b2, w3, b3 = params
    D = num_actor * c1                      # flattened obs features

    # Reference bug reproduced: the "action" half of the concat is obs again,
    # so x = concat(o, o) and   x @ W1 == o @ (W1[:D] + W1[D:]).
    # Folding halves the streamed input bytes and removes the concat.
    assert w1.shape[0] == 2 * D, (
        f"critic W1 expects {w1.shape[0]} inputs but the duplicated-obs concat "
        f"produces {2 * D}; check input_size/num_actor/obs_dim consistency.")
    w1_eff = w1[:D, :] + w1[D:, :]

    obs_flat = obs.reshape(a1, D)           # stays f32; kernel casts to bf16

    # Batch tiling: big tiles to amortize per-step overhead, minimal padding,
    # >=2 grid steps when the batch is large enough (v7x 2-TC sharding).
    B = a1
    if B <= tile_b:
        tb = _round_up(B, _SUBLANE)
        if tb >= 4 * _SUBLANE:
            tb = _round_up((B + 1) // 2, _SUBLANE)
    else:
        tb = tile_b
        for cand in (tile_b, tile_b // 2, tile_b // 4, tile_b // 8):
            if cand >= _SUBLANE and B % cand == 0:
                tb = cand
                break
    b_pad = _round_up(B, tb)
    if b_pad != B:                          # only the final partial tile is padded
        obs_flat = jnp.pad(obs_flat, ((0, b_pad - B), (0, 0)))

    # bf16 MXU operands, f32 accumulation; biases and the W3 row stay f32.
    w1c = w1_eff.astype(compute_dtype)
    w2c = w2.astype(compute_dtype)
    w3r = w3.T                              # (1, hidden2), f32
    out_dim = w3.shape[-1]

    hidden1 = w1.shape[1]
    hidden2 = w2.shape[1]
    flops = 2 * b_pad * (D * hidden1 + hidden1 * hidden2 + hidden2)
    bytes_accessed = (b_pad * D * 4                     # streamed obs-flat (f32)
                      + b_pad * out_dim * 4             # compact Q writeback
                      + w1c.size * 2 + w2c.size * 2     # bf16 weights (once)
                      + (b1.size + b2.size + w3r.size + b3.size) * 4)
    cost = pl.CostEstimate(flops=flops, transcendentals=0,
                           bytes_accessed=bytes_accessed)

    const2d = lambda i: (0, 0)              # weights/biases resident across grid
    grid = (b_pad // tb,)

    q_pad = pl.pallas_call(
        _critic_mlp_kernel,
        out_shape=jax.ShapeDtypeStruct((b_pad, out_dim), jnp.float32),
        grid_spec=pltpu.PrefetchScalarGridSpec(
            num_scalar_prefetch=0,
            grid=grid,
            in_specs=[
                pl.BlockSpec((tb, D), lambda i: (i, 0)),   # streamed obs-flat tile
                pl.BlockSpec(w1c.shape, const2d),
                pl.BlockSpec(b1.shape, const2d),
                pl.BlockSpec(w2c.shape, const2d),
                pl.BlockSpec(b2.shape, const2d),
                pl.BlockSpec(w3r.shape, const2d),
                pl.BlockSpec(b3.shape, const2d),
            ],
            out_specs=pl.BlockSpec((tb, out_dim), lambda i: (i, 0)),
        ),
        compiler_params=pltpu.CompilerParams(
            dimension_semantics=("parallel",),
        ),
        cost_estimate=cost,
    )(obs_flat, w1c, b1, w2c, b2, w3r, b3)

    return q_pad[:B, :]


if __name__ == "__main__":
    num_actor = 2
    batch = 2
    obs_dim = 8
    act_dim = 8      # "the input and output of the actor share the same dim"
    output_size = 1  # Q-value
    # DenseNet was built with input_size * num_actor features; the forward
    # concatenates two obs-flats, so input_size = obs_dim + act_dim.
    input_size = obs_dim + act_dim

    key = jax.random.PRNGKey(0)
    kp, ko, ka = jax.random.split(key, 3)
    params = init_critic_params(kp, num_actor, input_size, output_size)

    obs = jax.random.normal(ko, (batch, num_actor, obs_dim), jnp.float32)
    action = jax.random.normal(ka, (batch, num_actor, act_dim), jnp.float32)

    q = critic_forward(obs, action, params, num_actor=num_actor)
    jax.block_until_ready(q)
    assert q.shape == (batch, output_size)
    assert q.dtype == jnp.float32

    # Pure-JAX f32 reference of the same (bugged) forward for a sanity check.
    of = obs.reshape(batch, -1)
    x_ref = jnp.concatenate((of, of), axis=-1)
    w1, b1, w2, b2, w3, b3 = params
    h = jnp.maximum(x_ref @ w1 + b1, 0.0)
    h = jnp.maximum(h @ w2 + b2, 0.0)
    q_ref = h @ w3 + b3
    assert jnp.allclose(q, q_ref, rtol=5e-2, atol=5e-2), (q, q_ref)
    print("KERNEL_OK")
</pallas_src>

<mosaic_0001>
module attributes {stable_mosaic.version = 11 : i64} {
  func.func @_critic_mlp_kernel(%arg0: i32, %arg1: memref<8x16xf32, #tpu.memory_space<vmem>>, %arg2: memref<16x64xbf16, #tpu.memory_space<vmem>>, %arg3: memref<1x64xf32, #tpu.memory_space<vmem>>, %arg4: memref<64x64xbf16, #tpu.memory_space<vmem>>, %arg5: memref<1x64xf32, #tpu.memory_space<vmem>>, %arg6: memref<1x64xf32, #tpu.memory_space<vmem>>, %arg7: memref<1x1xf32, #tpu.memory_space<vmem>>, %arg8: memref<8x1xf32, #tpu.memory_space<vmem>>) attributes {dimension_semantics = [#tpu.dimension_semantics<parallel>], iteration_bounds = array<i64: 1>, scalar_prefetch = 0 : i64, scratch_operands = 0 : i64, tpu.core_type = #tpu.core_type<tc>, window_params = [{transform_indices = @transform_0, window_bounds = array<i64: 8, 16>}, {pipeline_mode = #tpu.pipeline_mode<synchronous>, transform_indices = @transform_1, window_bounds = array<i64: 16, 64>}, {pipeline_mode = #tpu.pipeline_mode<synchronous>, transform_indices = @transform_2, window_bounds = array<i64: 1, 64>}, {pipeline_mode = #tpu.pipeline_mode<synchronous>, transform_indices = @transform_3, window_bounds = array<i64: 64, 64>}, {pipeline_mode = #tpu.pipeline_mode<synchronous>, transform_indices = @transform_4, window_bounds = array<i64: 1, 64>}, {pipeline_mode = #tpu.pipeline_mode<synchronous>, transform_indices = @transform_5, window_bounds = array<i64: 1, 64>}, {pipeline_mode = #tpu.pipeline_mode<synchronous>, transform_indices = @transform_6, window_bounds = array<i64: 1, 1>}, {transform_indices = @transform_7, window_bounds = array<i64: 8, 1>}]} {
    %c0 = arith.constant 0 : index
    %c0_0 = arith.constant 0 : index
    %0 = vector.load %arg1[%c0, %c0_0] : memref<8x16xf32, #tpu.memory_space<vmem>>, vector<8x16xf32>
    %1 = arith.truncf %0 : vector<8x16xf32> to vector<8x16xbf16>
    %c0_1 = arith.constant 0 : index
    %c0_2 = arith.constant 0 : index
    %2 = vector.load %arg2[%c0_1, %c0_2] : memref<16x64xbf16, #tpu.memory_space<vmem>>, vector<16x64xbf16>
    %cst = arith.constant dense<0.000000e+00> : vector<8x64xf32>
    %3 = tpu.matmul %1, %2, %cst {dimension_numbers = #tpu.dot_dimension_numbers<[1], [0], [0], [1], [0, 0, 1, 1], [], []>} : vector<8x16xbf16>, vector<16x64xbf16>, vector<8x64xf32> -> vector<8x64xf32>
    %c0_3 = arith.constant 0 : index
    %c0_4 = arith.constant 0 : index
    %4 = vector.load %arg3[%c0_3, %c0_4] : memref<1x64xf32, #tpu.memory_space<vmem>>, vector<1x64xf32>
    %5 = vector.broadcast %4 : vector<1x64xf32> to vector<8x64xf32>
    %6 = arith.addf %3, %5 : vector<8x64xf32>
    %cst_5 = arith.constant 0.000000e+00 : f32
    %7 = vector.broadcast %cst_5 : f32 to vector<8x64xf32>
    %8 = arith.maximumf %6, %7 : vector<8x64xf32>
    %9 = arith.truncf %8 : vector<8x64xf32> to vector<8x64xbf16>
    %c0_6 = arith.constant 0 : index
    %c0_7 = arith.constant 0 : index
    %10 = vector.load %arg4[%c0_6, %c0_7] : memref<64x64xbf16, #tpu.memory_space<vmem>>, vector<64x64xbf16>
    %cst_8 = arith.constant dense<0.000000e+00> : vector<8x64xf32>
    %11 = tpu.matmul %9, %10, %cst_8 {dimension_numbers = #tpu.dot_dimension_numbers<[1], [0], [0], [1], [0, 0, 1, 1], [], []>} : vector<8x64xbf16>, vector<64x64xbf16>, vector<8x64xf32> -> vector<8x64xf32>
    %c0_9 = arith.constant 0 : index
    %c0_10 = arith.constant 0 : index
    %12 = vector.load %arg5[%c0_9, %c0_10] : memref<1x64xf32, #tpu.memory_space<vmem>>, vector<1x64xf32>
    %13 = vector.broadcast %12 : vector<1x64xf32> to vector<8x64xf32>
    %14 = arith.addf %11, %13 : vector<8x64xf32>
    %cst_11 = arith.constant 0.000000e+00 : f32
    %15 = vector.broadcast %cst_11 : f32 to vector<8x64xf32>
    %16 = arith.maximumf %14, %15 : vector<8x64xf32>
    %c0_12 = arith.constant 0 : index
    %c0_13 = arith.constant 0 : index
    %17 = vector.load %arg6[%c0_12, %c0_13] : memref<1x64xf32, #tpu.memory_space<vmem>>, vector<1x64xf32>
    %18 = vector.broadcast %17 : vector<1x64xf32> to vector<8x64xf32>
    %19 = arith.mulf %16, %18 : vector<8x64xf32>
    %cst_14 = arith.constant dense<0.000000e+00> : vector<8xf32>
    %20 = vector.multi_reduction <add>, %19, %cst_14 [1] : vector<8x64xf32> to vector<8xf32>
    %21 = vector.shape_cast %20 : vector<8xf32> to vector<8x1xf32>
    %c0_15 = arith.constant 0 : index
    %c0_16 = arith.constant 0 : index
    %22 = vector.load %arg7[%c0_15, %c0_16] : memref<1x1xf32, #tpu.memory_space<vmem>>, vector<1x1xf32>
    %23 = vector.broadcast %22 : vector<1x1xf32> to vector<8x1xf32>
    %24 = arith.addf %21, %23 : vector<8x1xf32>
    %c0_17 = arith.constant 0 : index
    %c0_18 = arith.constant 0 : index
    %25 = vector.load %arg8[%c0_17, %c0_18] : memref<8x1xf32, #tpu.memory_space<vmem>>, vector<8x1xf32>
    tpu.vector_store %arg8[%c0_17, %c0_18], %24 {strides = array<i32>} : memref<8x1xf32, #tpu.memory_space<vmem>>, vector<8x1xf32>,
    return
  }
  func.func @transform_0(%arg0: i32) -> (i32, i32) {
    %c0_i32 = arith.constant 0 : i32
    %c0_i32_0 = arith.constant 0 : i32
    return %arg0, %c0_i32 : i32, i32
  }
  func.func @transform_1(%arg0: i32) -> (i32, i32) {
    %c0_i32 = arith.constant 0 : i32
    %c0_i32_0 = arith.constant 0 : i32
    %c0_i32_1 = arith.constant 0 : i32
    return %c0_i32, %c0_i32_0 : i32, i32
  }
  func.func @transform_2(%arg0: i32) -> (i32, i32) {
    %c0_i32 = arith.constant 0 : i32
    %c0_i32_0 = arith.constant 0 : i32
    %c0_i32_1 = arith.constant 0 : i32
    return %c0_i32, %c0_i32_0 : i32, i32
  }
  func.func @transform_3(%arg0: i32) -> (i32, i32) {
    %c0_i32 = arith.constant 0 : i32
    %c0_i32_0 = arith.constant 0 : i32
    %c0_i32_1 = arith.constant 0 : i32
    return %c0_i32, %c0_i32_0 : i32, i32
  }
  func.func @transform_4(%arg0: i32) -> (i32, i32) {
    %c0_i32 = arith.constant 0 : i32
    %c0_i32_0 = arith.constant 0 : i32
    %c0_i32_1 = arith.constant 0 : i32
    return %c0_i32, %c0_i32_0 : i32, i32
  }
  func.func @transform_5(%arg0: i32) -> (i32, i32) {
    %c0_i32 = arith.constant 0 : i32
    %c0_i32_0 = arith.constant 0 : i32
    %c0_i32_1 = arith.constant 0 : i32
    return %c0_i32, %c0_i32_0 : i32, i32
  }
  func.func @transform_6(%arg0: i32) -> (i32, i32) {
    %c0_i32 = arith.constant 0 : i32
    %c0_i32_0 = arith.constant 0 : i32
    %c0_i32_1 = arith.constant 0 : i32
    return %c0_i32, %c0_i32_0 : i32, i32
  }
  func.func @transform_7(%arg0: i32) -> (i32, i32) {
    %c0_i32 = arith.constant 0 : i32
    %c0_i32_0 = arith.constant 0 : i32
    return %arg0, %c0_i32 : i32, i32
  }
}

</mosaic_0001>

<bundles_post_ra>
// kernel: critic_forward.1
= control target key start
LH: loop header
LB: loop body
LE: loop exit
PB: predicated region body
PF: predicated region fallthrough
CT: control target
= control target key end

     0   :  { %v244_v0 = vmov 0.0   ;;  %vm245_vm0 = vmmov 0   ;;  %vm46_vm1 = vcmask 130048   ;;  %vm131_vm2 = vcmask 523264   ;;  %s321_s1 = inlined_call_operand.vmem [shape: bf16[16,64], index: 1, kind: input, shape index: {}]   ;;  %s322_s0 = inlined_call_operand.vmem [shape: f32[8,16], index: 0, kind: input, shape index: {}]   ;;  %s323_s3 = inlined_call_operand.vmem [shape: bf16[64,64], index: 3, kind: input, shape index: {}]   ;;  %s324_s2 = inlined_call_operand.vmem [shape: f32[1,64], index: 2, kind: input, shape index: {}]   ;;  %s325_s6 = inlined_call_operand.<no memory space> [shape: f32[1,1], index: 6, kind: input, shape index: {}]   ;;  %s326_s4 = inlined_call_operand.vmem [shape: f32[1,64], index: 4, kind: input, shape index: {}]   ;;  %s327_s5 = inlined_call_operand.vmem [shape: f32[1,64], index: 5, kind: input, shape index: {}]   ;;  %s328_s7 = inlined_call_operand.vmem [shape: f32[8,1], index: 7, kind: output, shape index: {}]  }
   0x1   :  { %219 = vmatprep.subr.bf16.mxu0 %v244_v0  ;;  %v239_v1 = vld [vmem:[%s321_s1] sm:$0xff]   ;;  %221 = vmatprep.mubr.msk.bf16.mxu0 %vm245_vm0, %v244_v0  ;;  %v241_v5 = vld [vmem:[%s323_s3 + $0x8] sm:$0xff]   ;;  %v242_v6 = vld [vmem:[%s323_s3 + $0x10] sm:$0xff]   ;;  %v12_v16 = vstv %s325_s6  ;;  %vm195_vm3 = vcmask 7168  }
   0x2   :  { %v29_v2 = vld [vmem:[%s322_s0] sm:$0xff]  ;;  %225 = vmatprep.subr.bf16.mxu1 %v244_v0  ;;  %233 = vmatprep.mubr.msk.bf16.mxu1 %vm245_vm0, %v244_v0  ;;  %v243_v7 = vld [vmem:[%s323_s3 + $0x18] sm:$0xff]   ;;  %13 = vst [vmem:[#allocation2] sm:$0x1] %v12_v16 }
   0x3   :  { %220 = vmatpush3.bf16.msra.mxu0 %v239_v1  ;;  %v30_v3 = vpack.c.bf16 %v29_v2, %v29_v2  ;;  %v240_v4 = vld [vmem:[%s323_s3] sm:$0xff]  }
   0x4   :  { %226 = vmatpush3.bf16.msra.mxu1 %v240_v4  ;;  %v201_v8 = vld [vmem:[%s324_s2] ss:$0 sm:$0xff] }
   0x5   :  { %227 = vmatprep.subr.bf16.mxu1 %v244_v0  ;;  %v204_v17 = vld [vmem:[%s326_s4] ss:$0 sm:$0xff] }
   0x6   :  { %222 = vmatmul.mubr.msk.bf16.vlgmr.msra.gmra.mrb[0].mxu0 %vm46_vm1, %v30_v3  ;;  %v210_v22 = vld [vmem:[%s327_s5] ss:$0 sm:$0xff] }
   0x8   :  { %228 = vmatpush3.bf16.msra.mxu1 %v241_v5 }
   0x9   :  { %229 = vmatprep.subr.bf16.mxu1 %v244_v0  ;;  %v211_v27 = vld [vmem:[#allocation2] ss:$0 sm:$0xff] }
   0xc   :  { %230 = vmatpush3.bf16.msra.mxu1 %v242_v6 }
   0xd   :  { %231 = vmatprep.subr.bf16.mxu1 %v244_v0 }
  0x10   :  { %232 = vmatpush3.bf16.msra.mxu1 %v243_v7 }
  0xd9   :  { %v84_v9 = vpop.f32.mrb[0].mxu0 }
  0xda   :  { %v85_v10 = vadd.f32 %v201_v8, %v84_v9  ;;  %v223_v11 = vpop.f32.mrb[1].mxu0 }
  0xdb   :  { %v87_v12 = vpop.f32.mrb[2].mxu0 }
  0xdc   :  { %v90_v13 = vmax.f32 %v85_v10, 0.0  ;;  %v224_v14 = vpop.f32.mrb[3].mxu0 }
  0xde   :  { %v91_v15 = vpack.c.bf16 %v90_v13, %v90_v13 }
  0xe0   :  { %234 = vmatmul.mubr.msk.bf16.vlgmr.msra.gmra.mrb[0].mxu1 %vm131_vm2, %v91_v15 }
 0x1b3   :  { %v169_v18 = vpop.f32.mrb[0].mxu1 }
 0x1b4   :  { %v170_v19 = vadd.f32 %v204_v17, %v169_v18  ;;  %v235_v20 = vpop.f32.mrb[1].mxu1 }
 0x1b5   :  { %v172_v21 = vpop.f32.mrb[2].mxu1 }
 0x1b6   :  { %v175_v23 = vmax.f32 %v170_v19, 0.0  ;;  %v236_v24 = vpop.f32.mrb[3].mxu1 }
 0x1b8   :  { %v183_v25 = vmul.f32 %v210_v22, %v175_v23 }
 0x1ba   :  { %v184_v26 = vsel %vm131_vm2, %v183_v25, 0.0 }
 0x1bb   :  { %185 = vadd.xlane.f32.xlu0 %v184_v26 }
 0x248   :  { %v186_v28 = vpop.xlane.xlu0 %185 }
 0x249   :  { %v194_v29 = vadd.f32 %v211_v27, %v186_v28 }
 0x24b   :  { %196 = vst.msk [vmem:[%s328_s7] sm:$0xff] %vm195_vm3, %v194_v29 }

</bundles_post_ra>
